<compile_context>
chip_gen: v5e
topology: v5e:2x2
jax: 0.10.0
libtpu: 0.0.40
codegen_flags: <defaults>
</compile_context>

<pallas_src>
import functools

import jax
import jax.numpy as jnp
from jax import lax
from jax.experimental import pallas as pl
from jax.experimental.pallas import tpu as pltpu


_NEG_BIG = -1e30  # masks padded class columns out of the softmax


def _gradwrap_kernel(labels_ref, x_ref, w_ref, b_ref, dw_ref, db_ref,
                     *, total_batch):
    """One batch tile of fused forward (logits+softmax) + backward (dW, db).

    labels_ref: [tB, 1] int32   integer class ids (no one-hot DMA)
    x_ref:      [tB, D]  bf16
    w_ref:      [D, Cp]  bf16   classes padded to a multiple of 128
    b_ref:      [1, Cp]  f32    padded columns hold -1e30 (softmax mask)
    dw_ref:     [D, Cp]  f32    per-core resident accumulator (reduction axis)
    db_ref:     [1, Cp]  f32    per-core resident accumulator
    """
    k = pl.program_id(1)  # inner (reduction) axis

    @pl.when(k == 0)
    def _init():
        dw_ref[...] = jnp.zeros_like(dw_ref)
        db_ref[...] = jnp.zeros_like(db_ref)

    x = x_ref[...]          # bf16, used directly by both MXU passes
    w = w_ref[...]          # bf16
    b = b_ref[...]          # f32 (padded cols = -1e30)

    # ---- forward: logits + numerically stable softmax (f32 accumulation) ----
    logits = jnp.dot(x, w, preferred_element_type=jnp.float32) + b   # [tB, Cp]
    m = jnp.max(logits, axis=-1, keepdims=True)
    e = jnp.exp(logits - m)
    denom = jnp.sum(e, axis=-1, keepdims=True)
    probs = e * pl.reciprocal(denom, approx=True)                    # [tB, Cp]

    # ---- backward through mean softmax-CE: dlogits = (p - onehot) / B ----
    col_ids = lax.broadcasted_iota(jnp.int32, probs.shape, 1)
    onehot = (col_ids == labels_ref[...]).astype(jnp.float32)        # [tB, Cp]
    dlogits = probs - onehot                                          # f32, O(1)

    scale = jnp.float32(1.0 / total_batch)

    # dW tile: contract over the batch dim directly (no x.T materialization).
    # 1/B applied to the f32 result (keeps bf16 dlogits magnitudes ~O(1)).
    dw_ref[...] += scale * lax.dot_general(
        x, dlogits.astype(jnp.bfloat16),
        dimension_numbers=(((0,), (0,)), ((), ())),
        preferred_element_type=jnp.float32)                          # [D, Cp]
    # db: reduce over batch in f32 (exact).
    db_ref[...] += scale * jnp.sum(dlogits, axis=0, keepdims=True)   # [1, Cp]


def gradwrap(x, w, b, labels, *, batch_tile=None, core_splits=2):
    """GradWrap forward: grads of mean softmax-CE loss w.r.t. (W, b).

    x: [B, D] float, w: [D, C], b: [1, C], labels: [B] integer class ids.
    Returns (dW [D, C] f32, db [1, C] f32).
    """
    B, D = x.shape
    Dw, C = w.shape
    assert Dw == D and b.shape == (1, C) and labels.shape == (B,)

    # Lane-dense class padding (multiple of 128); padded cols masked via bias.
    Cp = max(128, ((C + 127) // 128) * 128)

    # Batch tile for the reduction grid axis (must divide B; >=8 sublanes).
    tB = batch_tile or min(B, 256)
    if B % tB != 0 or (tB % 8 != 0 and tB != B):
        tB = B
    assert B % tB == 0
    n_tiles = B // tB

    # Shard the batch reduction across TensorCores when there is enough work.
    splits = core_splits if (core_splits > 1 and n_tiles % core_splits == 0
                             and n_tiles >= core_splits) else 1
    steps = n_tiles // splits

    # bf16 matmul operands, f32 bias / accumulators.
    x_bf = x.astype(jnp.bfloat16)
    w_p = jnp.zeros((D, Cp), jnp.bfloat16).at[:, :C].set(w.astype(jnp.bfloat16))
    b_p = jnp.full((1, Cp), _NEG_BIG, jnp.float32).at[:, :C].set(
        b.astype(jnp.float32))
    labels2d = labels.astype(jnp.int32).reshape(B, 1)

    kernel = functools.partial(_gradwrap_kernel, total_batch=B)

    dw_p, db_p = pl.pallas_call(
        kernel,
        out_shape=(
            jax.ShapeDtypeStruct((splits, D, Cp), jnp.float32),
            jax.ShapeDtypeStruct((splits, 1, Cp), jnp.float32),
        ),
        grid=(splits, steps),
        in_specs=[
            pl.BlockSpec((tB, 1), lambda c, k: (c * steps + k, 0)),  # labels
            pl.BlockSpec((tB, D), lambda c, k: (c * steps + k, 0)),  # x tile
            pl.BlockSpec((D, Cp), lambda c, k: (0, 0)),              # W (resident)
            pl.BlockSpec((1, Cp), lambda c, k: (0, 0)),              # b (resident)
        ],
        out_specs=(
            pl.BlockSpec((None, D, Cp), lambda c, k: (c, 0, 0)),     # dW partial
            pl.BlockSpec((None, 1, Cp), lambda c, k: (c, 0, 0)),     # db partial
        ),
        compiler_params=pltpu.CompilerParams(
            dimension_semantics=("parallel", "arbitrary")),
    )(labels2d, x_bf, w_p, b_p)

    # Sum per-core partials and slice padded class columns back off.
    dw = jnp.sum(dw_p, axis=0)[:, :C]
    db = jnp.sum(db_p, axis=0)[:, :C]
    return dw, db


def _reference_grads(x, w, b, labels, C):
    """jax.grad reference using the same bf16-rounded inputs the kernel sees."""
    x_in = x.astype(jnp.bfloat16).astype(jnp.float32)
    w_in = w.astype(jnp.bfloat16).astype(jnp.float32)
    y1h = jax.nn.one_hot(labels, C, dtype=jnp.float32)

    def loss_fn(params):
        W, bb = params
        logits = x_in @ W + bb
        logp = jax.nn.log_softmax(logits, axis=-1)
        return -jnp.mean(jnp.sum(y1h * logp, axis=-1))

    return jax.grad(loss_fn)((w_in, b))


if __name__ == "__main__":
    key = jax.random.PRNGKey(0)

    # --- small test (matches the module's tiny-classifier usage) ---
    kx, kw, kb, kl = jax.random.split(key, 4)
    B, D, C = 8, 32, 8  # batch=8, hidden=32, classes=8
    x = jax.random.normal(kx, (B, D), dtype=jnp.float32)
    w = jax.random.normal(kw, (D, C), dtype=jnp.float32) * 0.1
    b = jax.random.normal(kb, (1, C), dtype=jnp.float32) * 0.01
    labels = jax.random.randint(kl, (B,), 0, C)

    dw, db = gradwrap(x, w, b, labels)
    jax.block_until_ready((dw, db))
    dw_ref, db_ref = _reference_grads(x, w, b, labels, C)
    assert jnp.allclose(dw, dw_ref, atol=2e-2, rtol=5e-2)
    assert jnp.allclose(db, db_ref, atol=2e-2, rtol=5e-2)

    # --- exercise the tiled / core-split reduction path (still small) ---
    kx2, kl2 = jax.random.split(jax.random.PRNGKey(1), 2)
    B2 = 64
    x2 = jax.random.normal(kx2, (B2, D), dtype=jnp.float32)
    labels2 = jax.random.randint(kl2, (B2,), 0, C)

    dw2, db2 = gradwrap(x2, w, b, labels2, batch_tile=16, core_splits=2)
    jax.block_until_ready((dw2, db2))
    dw2_ref, db2_ref = _reference_grads(x2, w, b, labels2, C)
    assert jnp.allclose(dw2, dw2_ref, atol=2e-2, rtol=5e-2)
    assert jnp.allclose(db2, db2_ref, atol=2e-2, rtol=5e-2)

    print("KERNEL_OK")
</pallas_src>

<mosaic_0001>
module attributes {stable_mosaic.version = 11 : i64} {
  func.func @_gradwrap_kernel(%arg0: i32, %arg1: i32, %arg2: memref<8x1xi32, #tpu.memory_space<vmem>>, %arg3: memref<8x32xbf16, #tpu.memory_space<vmem>>, %arg4: memref<32x128xbf16, #tpu.memory_space<vmem>>, %arg5: memref<1x128xf32, #tpu.memory_space<vmem>>, %arg6: memref<1x32x128xf32, #tpu.memory_space<vmem>>, %arg7: memref<1x1x128xf32, #tpu.memory_space<vmem>>) attributes {dimension_semantics = [#tpu.dimension_semantics<parallel>, #tpu.dimension_semantics<arbitrary>], iteration_bounds = array<i64: 1, 1>, scalar_prefetch = 0 : i64, scratch_operands = 0 : i64, tpu.core_type = #tpu.core_type<tc>, window_params = [{transform_indices = @transform_0, window_bounds = array<i64: 8, 1>}, {transform_indices = @transform_1, window_bounds = array<i64: 8, 32>}, {pipeline_mode = #tpu.pipeline_mode<synchronous>, transform_indices = @transform_2, window_bounds = array<i64: 32, 128>}, {pipeline_mode = #tpu.pipeline_mode<synchronous>, transform_indices = @transform_3, window_bounds = array<i64: 1, 128>}, {transform_indices = @transform_4, window_bounds = array<i64: 1, 32, 128>}, {transform_indices = @transform_5, window_bounds = array<i64: 1, 1, 128>}]} {
    %c0_i32 = arith.constant 0 : i32
    %0 = arith.cmpi eq, %arg1, %c0_i32 : i32
    %1 = arith.extui %0 : i1 to i32
    %c0_i32_0 = arith.constant 0 : i32
    %2 = arith.cmpi ne, %1, %c0_i32_0 : i32
    scf.if %2 {
      %cst_26 = arith.constant 0.000000e+00 : f32
      %46 = vector.broadcast %cst_26 : f32 to vector<32x128xf32>
      %c0_27 = arith.constant 0 : index
      %c0_28 = arith.constant 0 : index
      %c0_29 = arith.constant 0 : index
      %47 = vector.load %arg6[%c0_27, %c0_28, %c0_29] : memref<1x32x128xf32, #tpu.memory_space<vmem>>, vector<1x32x128xf32>
      %48 = vector.shape_cast %47 : vector<1x32x128xf32> to vector<32x128xf32>
      %49 = vector.shape_cast %46 : vector<32x128xf32> to vector<1x32x128xf32>
      tpu.vector_store %arg6[%c0_27, %c0_28, %c0_29], %49 {strides = array<i32>} : memref<1x32x128xf32, #tpu.memory_space<vmem>>, vector<1x32x128xf32>,
      %cst_30 = arith.constant 0.000000e+00 : f32
      %50 = vector.broadcast %cst_30 : f32 to vector<1x128xf32>
      %c0_31 = arith.constant 0 : index
      %c0_32 = arith.constant 0 : index
      %c0_33 = arith.constant 0 : index
      %51 = vector.load %arg7[%c0_31, %c0_32, %c0_33] : memref<1x1x128xf32, #tpu.memory_space<vmem>>, vector<1x1x128xf32>
      %52 = vector.shape_cast %51 : vector<1x1x128xf32> to vector<1x128xf32>
      %53 = vector.shape_cast %50 : vector<1x128xf32> to vector<1x1x128xf32>
      tpu.vector_store %arg7[%c0_31, %c0_32, %c0_33], %53 {strides = array<i32>} : memref<1x1x128xf32, #tpu.memory_space<vmem>>, vector<1x1x128xf32>,
    } else {
    }
    %c0 = arith.constant 0 : index
    %c0_1 = arith.constant 0 : index
    %3 = vector.load %arg3[%c0, %c0_1] : memref<8x32xbf16, #tpu.memory_space<vmem>>, vector<8x32xbf16>
    %c0_2 = arith.constant 0 : index
    %c0_3 = arith.constant 0 : index
    %4 = vector.load %arg4[%c0_2, %c0_3] : memref<32x128xbf16, #tpu.memory_space<vmem>>, vector<32x128xbf16>
    %c0_4 = arith.constant 0 : index
    %c0_5 = arith.constant 0 : index
    %5 = vector.load %arg5[%c0_4, %c0_5] : memref<1x128xf32, #tpu.memory_space<vmem>>, vector<1x128xf32>
    %cst = arith.constant dense<0.000000e+00> : vector<8x128xf32>
    %6 = tpu.matmul %3, %4, %cst {dimension_numbers = #tpu.dot_dimension_numbers<[1], [0], [0], [1], [0, 0, 1, 1], [], []>} : vector<8x32xbf16>, vector<32x128xbf16>, vector<8x128xf32> -> vector<8x128xf32>
    %7 = vector.broadcast %5 : vector<1x128xf32> to vector<8x128xf32>
    %8 = arith.addf %6, %7 : vector<8x128xf32>
    %cst_6 = arith.constant dense<0xFF800000> : vector<8xf32>
    %9 = vector.multi_reduction <maximumf>, %8, %cst_6 [1] : vector<8x128xf32> to vector<8xf32>
    %10 = vector.shape_cast %9 : vector<8xf32> to vector<8x1xf32>
    %11 = vector.broadcast %10 : vector<8x1xf32> to vector<8x128xf32>
    %12 = arith.subf %8, %11 : vector<8x128xf32>
    %13 = math.exp %12 : vector<8x128xf32>
    %cst_7 = arith.constant dense<0.000000e+00> : vector<8xf32>
    %14 = vector.multi_reduction <add>, %13, %cst_7 [1] : vector<8x128xf32> to vector<8xf32>
    %15 = vector.shape_cast %14 : vector<8xf32> to vector<8x1xf32>
    %16 = tpu.reciprocal %15 {approx = true} : vector<8x1xf32> -> vector<8x1xf32>
    %17 = vector.broadcast %16 : vector<8x1xf32> to vector<8x128xf32>
    %18 = arith.mulf %13, %17 : vector<8x128xf32>
    %19 = tpu.iota {dimensions = array<i32: 1>} : vector<8x128xi32>
    %c0_8 = arith.constant 0 : index
    %c0_9 = arith.constant 0 : index
    %20 = vector.load %arg2[%c0_8, %c0_9] : memref<8x1xi32, #tpu.memory_space<vmem>>, vector<8x1xi32>
    %21 = vector.broadcast %20 : vector<8x1xi32> to vector<8x128xi32>
    %22 = arith.cmpi eq, %19, %21 : vector<8x128xi32>
    %23 = arith.extui %22 : vector<8x128xi1> to vector<8x128xi32>
    %24 = arith.sitofp %23 : vector<8x128xi32> to vector<8x128xf32>
    %25 = arith.subf %18, %24 : vector<8x128xf32>
    %c0_10 = arith.constant 0 : index
    %c0_11 = arith.constant 0 : index
    %c0_12 = arith.constant 0 : index
    %26 = vector.load %arg6[%c0_10, %c0_11, %c0_12] : memref<1x32x128xf32, #tpu.memory_space<vmem>>, vector<1x32x128xf32>
    %27 = vector.shape_cast %26 : vector<1x32x128xf32> to vector<32x128xf32>
    %28 = arith.truncf %25 : vector<8x128xf32> to vector<8x128xbf16>
    %cst_13 = arith.constant dense<0.000000e+00> : vector<32x128xf32>
    %29 = tpu.matmul %3, %28, %cst_13 {dimension_numbers = #tpu.dot_dimension_numbers<[0], [0], [1], [1], [0, 1, 1, 1], [], []>} : vector<8x32xbf16>, vector<8x128xbf16>, vector<32x128xf32> -> vector<32x128xf32>
    %cst_14 = arith.constant 1.250000e-01 : f32
    %30 = vector.broadcast %cst_14 : f32 to vector<32x128xf32>
    %31 = arith.mulf %30, %29 : vector<32x128xf32>
    %32 = arith.addf %27, %31 : vector<32x128xf32>
    %c0_15 = arith.constant 0 : index
    %c0_16 = arith.constant 0 : index
    %c0_17 = arith.constant 0 : index
    %33 = vector.load %arg6[%c0_15, %c0_16, %c0_17] : memref<1x32x128xf32, #tpu.memory_space<vmem>>, vector<1x32x128xf32>
    %34 = vector.shape_cast %33 : vector<1x32x128xf32> to vector<32x128xf32>
    %35 = vector.shape_cast %32 : vector<32x128xf32> to vector<1x32x128xf32>
    tpu.vector_store %arg6[%c0_15, %c0_16, %c0_17], %35 {strides = array<i32>} : memref<1x32x128xf32, #tpu.memory_space<vmem>>, vector<1x32x128xf32>,
    %c0_18 = arith.constant 0 : index
    %c0_19 = arith.constant 0 : index
    %c0_20 = arith.constant 0 : index
    %36 = vector.load %arg7[%c0_18, %c0_19, %c0_20] : memref<1x1x128xf32, #tpu.memory_space<vmem>>, vector<1x1x128xf32>
    %37 = vector.shape_cast %36 : vector<1x1x128xf32> to vector<1x128xf32>
    %cst_21 = arith.constant dense<0.000000e+00> : vector<128xf32>
    %38 = vector.multi_reduction <add>, %25, %cst_21 [0] : vector<8x128xf32> to vector<128xf32>
    %39 = vector.shape_cast %38 : vector<128xf32> to vector<1x128xf32>
    %cst_22 = arith.constant 1.250000e-01 : f32
    %40 = vector.broadcast %cst_22 : f32 to vector<1x128xf32>
    %41 = arith.mulf %40, %39 : vector<1x128xf32>
    %42 = arith.addf %37, %41 : vector<1x128xf32>
    %c0_23 = arith.constant 0 : index
    %c0_24 = arith.constant 0 : index
    %c0_25 = arith.constant 0 : index
    %43 = vector.load %arg7[%c0_23, %c0_24, %c0_25] : memref<1x1x128xf32, #tpu.memory_space<vmem>>, vector<1x1x128xf32>
    %44 = vector.shape_cast %43 : vector<1x1x128xf32> to vector<1x128xf32>
    %45 = vector.shape_cast %42 : vector<1x128xf32> to vector<1x1x128xf32>
    tpu.vector_store %arg7[%c0_23, %c0_24, %c0_25], %45 {strides = array<i32>} : memref<1x1x128xf32, #tpu.memory_space<vmem>>, vector<1x1x128xf32>,
    return
  }
  func.func @transform_0(%arg0: i32, %arg1: i32) -> (i32, i32) {
    %c1_i32 = arith.constant 1 : i32
    %0 = arith.muli %arg0, %c1_i32 : i32
    %1 = arith.addi %0, %arg1 : i32
    %c0_i32 = arith.constant 0 : i32
    %c0_i32_0 = arith.constant 0 : i32
    return %1, %c0_i32 : i32, i32
  }
  func.func @transform_1(%arg0: i32, %arg1: i32) -> (i32, i32) {
    %c1_i32 = arith.constant 1 : i32
    %0 = arith.muli %arg0, %c1_i32 : i32
    %1 = arith.addi %0, %arg1 : i32
    %c0_i32 = arith.constant 0 : i32
    %c0_i32_0 = arith.constant 0 : i32
    return %1, %c0_i32 : i32, i32
  }
  func.func @transform_2(%arg0: i32, %arg1: i32) -> (i32, i32) {
    %c0_i32 = arith.constant 0 : i32
    %c0_i32_0 = arith.constant 0 : i32
    %c0_i32_1 = arith.constant 0 : i32
    return %c0_i32, %c0_i32_0 : i32, i32
  }
  func.func @transform_3(%arg0: i32, %arg1: i32) -> (i32, i32) {
    %c0_i32 = arith.constant 0 : i32
    %c0_i32_0 = arith.constant 0 : i32
    %c0_i32_1 = arith.constant 0 : i32
    return %c0_i32, %c0_i32_0 : i32, i32
  }
  func.func @transform_4(%arg0: i32, %arg1: i32) -> (i32, i32, i32) {
    %c0_i32 = arith.constant 0 : i32
    %c0_i32_0 = arith.constant 0 : i32
    %c0_i32_1 = arith.constant 0 : i32
    return %arg0, %c0_i32, %c0_i32_0 : i32, i32, i32
  }
  func.func @transform_5(%arg0: i32, %arg1: i32) -> (i32, i32, i32) {
    %c0_i32 = arith.constant 0 : i32
    %c0_i32_0 = arith.constant 0 : i32
    %c0_i32_1 = arith.constant 0 : i32
    return %arg0, %c0_i32, %c0_i32_0 : i32, i32, i32
  }
}

</mosaic_0001>

<bundles_post_ra>
// kernel: tpu_custom_call.1
= control target key start
LH: loop header
LB: loop body
LE: loop exit
PB: predicated region body
PF: predicated region fallthrough
CT: control target
= control target key end

     0   :  { %11 = vsyncpa [#allocation3], 0  ;;  %s424_s0 = inlined_call_operand.vmem [shape: s32[8,1], index: 0, kind: input, shape index: {}]   ;;  %s425_s1 = inlined_call_operand.vmem [shape: bf16[8,32], index: 1, kind: input, shape index: {}]   ;;  %s426_s2 = inlined_call_operand.hbm [shape: bf16[32,128], index: 2, kind: input, shape index: {}]   ;;  %s427_s3 = inlined_call_operand.vmem [shape: f32[1,128], index: 3, kind: input, shape index: {}]   ;;  %s428_s4 = inlined_call_operand.hbm [shape: f32[1,32,128], index: 4, kind: output, shape index: {0}]   ;;  %s429_s5 = inlined_call_operand.hbm [shape: f32[1,1,128], index: 5, kind: output, shape index: {1}]  }
   0x1   :  { %12 = vsyncpa [#allocation4], 0 }
   0x2   :  { %13 = vsyncpa [#allocation7], 0  ;;  %s34_s20 = sshll.u32 %s426_s2, 4  ;;  %s367_s21 = smov [#allocation2]   ;;  %s35_s20 = int_to_ptr.hbm [resolvable:$true] %s34_s20 }
   0x3   :  { %s36_s22 = sshll.u32 %s367_s21, 4  ;;  %s368_s23 = smov 64   ;;  %s37_s22 = int_to_ptr.vmem [resolvable:$true] %s36_s22 }
   0x4   :  { %s369_s24 = smov 4  }
   0x5   :  { %42 = dma.hbm_to_vmem [thread:$0]  %s35_s20, 256, %s37_s22, [#allocation3], %s368_s23, %s368_s23, %s369_s24  }
   0x6   :  { %361 = dma.done.wait [#allocation3], 256  }
   0x7   :  { %362 = vsyncadd [#allocation3], 4294967040  ;;  %v271_v0 = vld [vmem:[#allocation2 + $0x8] sm:$0xff]  ;;  %v270_v1 = vld [vmem:[#allocation2] sm:$0xff]  ;;  %vm102_vm0 = vcmask 261120   ;;  %v370_v4 = vmov 0   ;;  %v128_v15 = vlaneseq }
   0x8   :  { %112 = vmatpush.bf16.msra.mxu0 %v271_v0  ;;  %v81_v2 = vld [vmem:[%s425_s1] sm:$0xf]  ;;  %282 = vset.pattern.permute.xlu1 %v370_v4  ;;  %v371_v9 = vmov 0.0   ;;  %vm166_vm2 = vcmask 1043456   ;;  %vm159_vm3 = vcmask 64512   ;;  %s231_s6 = sshll.u32 %s429_s5, 4  ;;  %s232_s6 = int_to_ptr.hbm [resolvable:$true] %s231_s6 }
   0x9   :  { %v130_v3 = vld [vmem:[%s424_s0] sm:$0xff]  ;;  %283 = vset.pattern.permute.xlu0 %v370_v4  ;;  %80 = vst [vmem:[#allocation6] sm:$0x1] %v371_v9  ;;  %v129_v17 = vand.u32 127, %v128_v15  ;;  %s372_s0 = smov [#allocation6]   ;;  %s373_s7 = smov [#allocation5]  }
   0xa   :  { %132 = vperm.xlu1 %282, %v130_v3   ;;  %v284_v5 = vld [vmem:[%s427_s3] ss:$0 sm:$0xff]  ;;  %s229_s1 = sshll.u32 %s372_s0, 4  ;;  %s215_s8 = sshll.u32 %s373_s7, 4  ;;  %s230_s1 = int_to_ptr.vmem [resolvable:$true] %s229_s1  ;;  %s216_s8 = int_to_ptr.vmem [resolvable:$true] %s215_s8 }
   0xb   :  { %s217_s11 = sshll.u32 %s428_s4, 4  ;;  %s374_s5 = smov 128   ;;  %s218_s11 = int_to_ptr.hbm [resolvable:$true] %s217_s11 }
   0xc   :  { %113 = vmatpush.bf16.msra.mxu0 %v270_v1  ;;  %s375_s12 = smov 8  }
   0xf   :  { %266 = vmatmul.msk.bf16.vlgmr.msra.gmra.mxu0 %vm102_vm0, %v81_v2 }
  0x10   :  { %v201_v32 = vld [vmem:[#allocation6] sm:$0x1] }
  0x3f   :  { %143 = vxpose.xlu1.c.b16.start.end [1/1] (short) (narrow) %v81_v2, 32 }
  0x7c   :  { %v133_v14 = vpop.permute.xlu1 %132 }
  0x7d   :  { %vm134_vm1 = vcmp.eq.s32.totalorder %v129_v17, %v133_v14 }
  0x7e   :  { %v267_v21 = vsel %vm134_vm1, 1.0, %v371_v9 }
  0x8c   :  { %v115_v6 = vpop.f32.mrf.mxu0 }
  0x8d   :  { %v116_v7 = vadd.f32 %v284_v5, %v115_v6 }
  0x8f   :  { %119 = vmax.xlane.f32.xlu0 %v116_v7 }
  0x94   :  { %v117_v8 = vpop.f32.mrf.mxu0 }
  0xeb   :  { %v151_v18 = vpop.trf.xlu1 }
  0xfb   :  { %v152_v27 = vpop.trf.xlu1 }
 0x102   :  { %v120_v10 = vpop.xlane.xlu0 %119 }
 0x103   :  { %v121_v11 = vsub.f32 %v116_v7, %v120_v10 }
 0x105   :  { %v122_v12 = vmul.f32 1.442695, %v121_v11 }
 0x107   :  { %285 = vpow2.f32 %v122_v12 }
 0x10d   :  { %v286_v13 = vpop.eup %285 }
 0x10e   :  { %124 = vadd.xlane.f32.xlu0 %v286_v13 }
 0x181   :  { %v125_v16 = vpop.xlane.xlu0 %124 }
 0x182   :  { %287 = vrcp.f32 %v125_v16 }
 0x188   :  { %v288_v19 = vpop.eup %287 }
 0x189   :  { %v127_v20 = vmul.f32 %v288_v19, %v286_v13 }
 0x18b   :  { %v137_v22 = vsub.f32 %v127_v20, %v267_v21 }
 0x18d   :  { %v142_v23 = vpack.c.bf16 %v137_v22, %v137_v22  ;;  %v202_v24 = vrot.slane %v137_v22, 4 }
 0x18f   :  { %v168_v25 = vsel %vm166_vm2, %v142_v23, 0  ;;  %v203_v26 = vadd.f32 %v202_v24, %v137_v22 }
 0x190   :  { %177 = vmatpush.bf16.msra.mxu1 %v168_v25  ;;  %272 = vmatpush.bf16.msra.mxu2 %v168_v25 }
 0x191   :  { %v204_v28 = vrot.slane %v203_v26, 2 }
 0x193   :  { %268 = vmatmul.msk.bf16.vlgmr.msra.gmra.mxu1 %vm159_vm3, %v151_v18  ;;  %269 = vmatmul.msk.bf16.vlgmr.msra.gmra.mxu2 %vm159_vm3, %v152_v27  ;;  %v205_v29 = vadd.f32 %v204_v28, %v203_v26 }
 0x195   :  { %v206_v30 = vrot.slane %v205_v29, 1 }
 0x197   :  { %v207_v31 = vadd.f32 %v206_v30, %v205_v29 }
 0x199   :  { %v208_v33 = vmul.f32 0.125, %v207_v31 }
 0x19b   :  { %v209_v34 = vadd.f32 %v208_v33, %v201_v32 }
 0x19d   :  { %210 = vst [vmem:[#allocation6] sm:$0x1] %v209_v34 }
 0x19e   :  { %234 = dma.vmem_to_hbm [thread:$0]  %s230_s1, 16, %s232_s6, [#allocation7]  }
 0x210   :  { %v179_v35 = vpop.f32.mrf.mxu1 }
 0x211   :  { %v189_v36 = vmul.f32 0.125, %v179_v35 }
 0x213   :  { %197 = vst [vmem:[#allocation5] sm:$0xff] %v189_v36 }
 0x216   :  { %v184_v37 = vpop.f32.mrf.mxu2 }
 0x217   :  { %v191_v38 = vmul.f32 0.125, %v184_v37 }
 0x218   :  { %v181_v39 = vpop.f32.mrf.mxu1 }
 0x219   :  { %v190_v40 = vmul.f32 0.125, %v181_v39  ;;  %199 = vst [vmem:[#allocation5 + $0x10] sm:$0xff] %v191_v38 }
 0x21b   :  { %198 = vst [vmem:[#allocation5 + $0x8] sm:$0xff] %v190_v40 }
 0x21e   :  { %v186_v41 = vpop.f32.mrf.mxu2 }
 0x21f   :  { %v192_v42 = vmul.f32 0.125, %v186_v41 }
 0x221   :  { %200 = vst [vmem:[#allocation5 + $0x18] sm:$0xff] %v192_v42 }
 0x222   :  { %223 = dma.vmem_to_hbm [thread:$0]  %s216_s8, 512, %s218_s11, [#allocation4], %s374_s5, %s374_s5, %s375_s12  }
 0x223   :  { %363 = dma.done.wait [#allocation4], 512  }
 0x224   :  { %364 = vsyncadd [#allocation4], 4294966784 }
 0x225   :  { %365 = dma.done.wait [#allocation7], 16  }
 0x226   :  { %366 = vsyncadd [#allocation7], 4294967280 }
 0x227   :  { %243 = vsyncpa [#allocation3], 1 }
 0x228   :  { %244 = vsyncpa [#allocation4], 1 }
 0x229   :  { %245 = vsyncpa [#allocation7], 1 }

</bundles_post_ra>
